<compile_context>
chip_gen: v7x
topology: tpu7x:2x2x1
jax: 0.10.0
libtpu: 0.0.40
codegen_flags: <defaults>
</compile_context>

<pallas_src>
import functools

import jax
import jax.numpy as jnp
from jax.experimental import pallas as pl
from jax.experimental.pallas import tpu as pltpu

LANE = 128  # TPU lane width — output head padded to be lane-dense


def _round_up(x, m):
    return (x + m - 1) // m * m


# -----------------------------------------------------------------------------
# Fused kernel: per-ray color MLP + masked partial MSE, one grid step per tile.
#   rgb = sigmoid( relu( feat @ W1a + b1_eff ) @ W2_pad + b2_pad )
#   partial[lane] = sum_over_tile_rays( mask * (rgb - gt)^2 )
# -----------------------------------------------------------------------------
def _fused_render_loss_kernel(feat_ref, gt_ref, w1a_ref, b1e_ref, w2_ref,
                              b2_ref, rgb_ref, part_ref, *, n_valid, tile):
    # Layer 1: MXU matmul (bf16 operands, f32 accumulate); latent contribution
    # is pre-folded into b1_eff in the wrapper.
    h = jnp.dot(feat_ref[...], w1a_ref[...], preferred_element_type=jnp.float32)
    h = jnp.maximum(h + b1e_ref[...], 0.0)                       # f32 VPU

    # Layer 2: lane-dense output head + sigmoid (EUP), f32 accumulate.
    rgb = jnp.dot(h.astype(w2_ref.dtype), w2_ref[...],
                  preferred_element_type=jnp.float32) + b2_ref[...]
    rgb = jax.nn.sigmoid(rgb)                                    # (tile, 128) f32
    rgb_ref[...] = rgb.astype(rgb_ref.dtype)                     # unmasked vst

    # Fused masked MSE: mask padded rays (row >= n_valid) and padded lanes (>=3).
    row = (pl.program_id(0) * tile
           + jax.lax.broadcasted_iota(jnp.int32, (tile, LANE), 0))
    col = jax.lax.broadcasted_iota(jnp.int32, (tile, LANE), 1)
    mask = jnp.logical_and(row < n_valid, col < 3).astype(jnp.float32)
    d = (rgb - gt_ref[...]) * mask
    # Reduce only over the sublane (ray) axis; the cheap cross-lane/cross-tile
    # finish happens in plain JAX on the (num_tiles, 128) partials.
    part_ref[...] = jnp.sum(d * d, axis=0, keepdims=True)


def render_and_loss(feat, rgb_gt, latent, w1a, w1b, b1, w2, b2,
                    *, tile=512, matmul_dtype=jnp.bfloat16):
    """Returns (rgb_map (N,3) f32, img_loss scalar f32) from a single kernel."""
    n, f = feat.shape
    hdim = w1a.shape[1]
    assert rgb_gt.shape == (n, 3)

    tile = min(tile, _round_up(n, 8))
    n_pad = _round_up(n, tile)
    num_tiles = n_pad // tile

    # Hoist the grid-invariant latent contribution into an effective bias.
    b1_eff = (latent.astype(jnp.float32) @ w1b.astype(jnp.float32)
              + b1.astype(jnp.float32))                               # (1, H)

    # Lane-dense output head: zero-pad W2 / b2 / rgb_gt out to 128 lanes.
    w2_pad = jnp.zeros((hdim, LANE), jnp.float32).at[:, :3].set(w2)
    b2_pad = jnp.zeros((1, LANE), jnp.float32).at[:, :3].set(b2)
    gt_pad = jnp.zeros((n_pad, LANE), jnp.float32).at[:n, :3].set(rgb_gt)

    # Pad rays to a tile multiple; padded rows are masked out of the loss.
    feat_pad = jnp.zeros((n_pad, f), feat.dtype).at[:n].set(feat)

    # Matmul operands in bf16 (f32 accumulate inside the kernel).
    feat_mm = feat_pad.astype(matmul_dtype)
    w1a_mm = w1a.astype(matmul_dtype)
    w2_mm = w2_pad.astype(matmul_dtype)

    kernel = functools.partial(_fused_render_loss_kernel, n_valid=n, tile=tile)
    rgb_slab, partials = pl.pallas_call(
        kernel,
        out_shape=(
            jax.ShapeDtypeStruct((n_pad, LANE), jnp.float32),
            jax.ShapeDtypeStruct((num_tiles, LANE), jnp.float32),
        ),
        grid_spec=pltpu.PrefetchScalarGridSpec(
            num_scalar_prefetch=0,
            grid=(num_tiles,),
            in_specs=[
                pl.BlockSpec((tile, f), lambda i: (i, 0)),      # per-ray features
                pl.BlockSpec((tile, LANE), lambda i: (i, 0)),   # rgb_gt (padded)
                pl.BlockSpec((f, hdim), lambda i: (0, 0)),      # W1a
                pl.BlockSpec((1, hdim), lambda i: (0, 0)),      # b1_eff (hoisted)
                pl.BlockSpec((hdim, LANE), lambda i: (0, 0)),   # W2 (lane-padded)
                pl.BlockSpec((1, LANE), lambda i: (0, 0)),      # b2 (lane-padded)
            ],
            out_specs=(
                pl.BlockSpec((tile, LANE), lambda i: (i, 0)),   # rgb slab
                pl.BlockSpec((1, LANE), lambda i: (i, 0)),      # per-tile partial
            ),
        ),
        compiler_params=pltpu.CompilerParams(
            dimension_semantics=("parallel",)),                 # v7x: 2-TC shardable
    )(feat_mm, gt_pad, w1a_mm, b1_eff, w2_mm, b2_pad)

    rgb_map = rgb_slab[:n, :3]
    img_loss = jnp.sum(partials) / jnp.float32(n * 3)
    return rgb_map, img_loss


# -----------------------------------------------------------------------------
# NetworkWrapper.forward equivalent
# -----------------------------------------------------------------------------
def network_wrapper_forward(batch, params):
    # "renderer.render(batch)" stand-in: latent-conditioned color MLP hot path,
    # fused with img2mse in a single pallas_call.
    rgb_map, img_loss = render_and_loss(
        batch["ray_feat"], batch["rgb_gt"], params["color_latent"],
        params["w1a"], params["w1b"], params["b1"], params["w2"], params["b2"])
    ret = {"rgb_map": rgb_map, "rgb_gt": batch["rgb_gt"]}
    loss = img_loss
    scalar_stats = {"img_loss": img_loss, "loss": loss}
    image_stats = {}
    # TODO(synk): the real renderer (NeRF volume rendering over SMPL parts) has
    # no clean standalone Pallas equivalent; replaced by the latent-conditioned
    # color MLP hot path above.
    return ret, loss, scalar_stats, image_stats


if __name__ == "__main__":
    key = jax.random.PRNGKey(0)
    k_feat, k_gt, k_lat, k_w1a, k_w1b, k_b1, k_w2, k_b2 = jax.random.split(key, 8)

    N_RAYS = 256      # number of sampled rays (small)
    FEAT = 32         # per-ray feature dim
    LATENT = 16       # color latent dim
    HIDDEN = 64       # color-network hidden width

    batch = {
        "ray_feat": jax.random.normal(k_feat, (N_RAYS, FEAT), jnp.float32),
        "rgb_gt": jax.random.uniform(k_gt, (N_RAYS, 3), jnp.float32),
    }
    params = {
        "color_latent": jax.random.normal(k_lat, (1, LATENT), jnp.float32) * 0.1,
        "w1a": jax.random.normal(k_w1a, (FEAT, HIDDEN), jnp.float32) * 0.1,
        "w1b": jax.random.normal(k_w1b, (LATENT, HIDDEN), jnp.float32) * 0.1,
        "b1": jax.random.normal(k_b1, (1, HIDDEN), jnp.float32) * 0.01,
        "w2": jax.random.normal(k_w2, (HIDDEN, 3), jnp.float32) * 0.1,
        "b2": jax.random.normal(k_b2, (1, 3), jnp.float32) * 0.01,
    }

    ret, loss, scalar_stats, image_stats = network_wrapper_forward(batch, params)
    jax.block_until_ready((ret["rgb_map"], loss))

    # Sanity check against a pure-JAX reference that applies the SAME bf16
    # casts to the matmul operands (f32 accumulate), mirroring the kernel.
    mm = jnp.bfloat16
    feat = batch["ray_feat"]
    b1_eff_ref = params["color_latent"] @ params["w1b"] + params["b1"]
    h_ref = jnp.maximum(
        jnp.dot(feat.astype(mm), params["w1a"].astype(mm),
                preferred_element_type=jnp.float32) + b1_eff_ref, 0.0)
    rgb_ref = jax.nn.sigmoid(
        jnp.dot(h_ref.astype(mm), params["w2"].astype(mm),
                preferred_element_type=jnp.float32) + params["b2"])
    loss_ref = jnp.mean((rgb_ref - batch["rgb_gt"]) ** 2)

    assert ret["rgb_map"].shape == (N_RAYS, 3)
    assert jnp.allclose(ret["rgb_map"], rgb_ref, atol=1e-4)
    assert jnp.allclose(loss, loss_ref, rtol=1e-4, atol=1e-6)

    print("KERNEL_OK")
</pallas_src>

<mosaic_0001>
module attributes {stable_mosaic.version = 11 : i64} {
  func.func @_fused_render_loss_kernel(%arg0: i32, %arg1: memref<256x32xbf16, #tpu.memory_space<vmem>>, %arg2: memref<256x128xf32, #tpu.memory_space<vmem>>, %arg3: memref<32x64xbf16, #tpu.memory_space<vmem>>, %arg4: memref<1x64xf32, #tpu.memory_space<vmem>>, %arg5: memref<64x128xbf16, #tpu.memory_space<vmem>>, %arg6: memref<1x128xf32, #tpu.memory_space<vmem>>, %arg7: memref<256x128xf32, #tpu.memory_space<vmem>>, %arg8: memref<1x128xf32, #tpu.memory_space<vmem>>) attributes {dimension_semantics = [#tpu.dimension_semantics<parallel>], iteration_bounds = array<i64: 1>, scalar_prefetch = 0 : i64, scratch_operands = 0 : i64, tpu.core_type = #tpu.core_type<tc>, window_params = [{transform_indices = @transform_0, window_bounds = array<i64: 256, 32>}, {transform_indices = @transform_1, window_bounds = array<i64: 256, 128>}, {pipeline_mode = #tpu.pipeline_mode<synchronous>, transform_indices = @transform_2, window_bounds = array<i64: 32, 64>}, {pipeline_mode = #tpu.pipeline_mode<synchronous>, transform_indices = @transform_3, window_bounds = array<i64: 1, 64>}, {pipeline_mode = #tpu.pipeline_mode<synchronous>, transform_indices = @transform_4, window_bounds = array<i64: 64, 128>}, {pipeline_mode = #tpu.pipeline_mode<synchronous>, transform_indices = @transform_5, window_bounds = array<i64: 1, 128>}, {transform_indices = @transform_6, window_bounds = array<i64: 256, 128>}, {transform_indices = @transform_7, window_bounds = array<i64: 1, 128>}]} {
    %c0 = arith.constant 0 : index
    %c0_0 = arith.constant 0 : index
    %0 = vector.load %arg1[%c0, %c0_0] : memref<256x32xbf16, #tpu.memory_space<vmem>>, vector<256x32xbf16>
    %c0_1 = arith.constant 0 : index
    %c0_2 = arith.constant 0 : index
    %1 = vector.load %arg3[%c0_1, %c0_2] : memref<32x64xbf16, #tpu.memory_space<vmem>>, vector<32x64xbf16>
    %cst = arith.constant dense<0.000000e+00> : vector<256x64xf32>
    %2 = tpu.matmul %0, %1, %cst {dimension_numbers = #tpu.dot_dimension_numbers<[1], [0], [0], [1], [0, 0, 1, 1], [], []>} : vector<256x32xbf16>, vector<32x64xbf16>, vector<256x64xf32> -> vector<256x64xf32>
    %c0_3 = arith.constant 0 : index
    %c0_4 = arith.constant 0 : index
    %3 = vector.load %arg4[%c0_3, %c0_4] : memref<1x64xf32, #tpu.memory_space<vmem>>, vector<1x64xf32>
    %4 = vector.broadcast %3 : vector<1x64xf32> to vector<256x64xf32>
    %5 = arith.addf %2, %4 : vector<256x64xf32>
    %cst_5 = arith.constant 0.000000e+00 : f32
    %6 = vector.broadcast %cst_5 : f32 to vector<256x64xf32>
    %7 = arith.maximumf %5, %6 : vector<256x64xf32>
    %8 = arith.truncf %7 : vector<256x64xf32> to vector<256x64xbf16>
    %c0_6 = arith.constant 0 : index
    %c0_7 = arith.constant 0 : index
    %9 = vector.load %arg5[%c0_6, %c0_7] : memref<64x128xbf16, #tpu.memory_space<vmem>>, vector<64x128xbf16>
    %cst_8 = arith.constant dense<0.000000e+00> : vector<256x128xf32>
    %10 = tpu.matmul %8, %9, %cst_8 {dimension_numbers = #tpu.dot_dimension_numbers<[1], [0], [0], [1], [0, 0, 1, 1], [], []>} : vector<256x64xbf16>, vector<64x128xbf16>, vector<256x128xf32> -> vector<256x128xf32>
    %c0_9 = arith.constant 0 : index
    %c0_10 = arith.constant 0 : index
    %11 = vector.load %arg6[%c0_9, %c0_10] : memref<1x128xf32, #tpu.memory_space<vmem>>, vector<1x128xf32>
    %12 = vector.broadcast %11 : vector<1x128xf32> to vector<256x128xf32>
    %13 = arith.addf %10, %12 : vector<256x128xf32>
    %14 = arith.negf %13 : vector<256x128xf32>
    %15 = math.exp %14 : vector<256x128xf32>
    %cst_11 = arith.constant 1.000000e+00 : f32
    %16 = vector.broadcast %cst_11 : f32 to vector<256x128xf32>
    %17 = arith.addf %16, %15 : vector<256x128xf32>
    %18 = arith.divf %16, %17 : vector<256x128xf32>
    %c0_12 = arith.constant 0 : index
    %c0_13 = arith.constant 0 : index
    %19 = vector.load %arg7[%c0_12, %c0_13] : memref<256x128xf32, #tpu.memory_space<vmem>>, vector<256x128xf32>
    tpu.vector_store %arg7[%c0_12, %c0_13], %18 {strides = array<i32>} : memref<256x128xf32, #tpu.memory_space<vmem>>, vector<256x128xf32>,
    %c256_i32 = arith.constant 256 : i32
    %20 = arith.muli %arg0, %c256_i32 : i32
    %21 = tpu.iota {dimensions = array<i32: 0>} : vector<256x128xi32>
    %22 = vector.broadcast %20 : i32 to vector<256x128xi32>
    %23 = arith.addi %22, %21 : vector<256x128xi32>
    %24 = tpu.iota {dimensions = array<i32: 1>} : vector<256x128xi32>
    %c256_i32_14 = arith.constant 256 : i32
    %25 = vector.broadcast %c256_i32_14 : i32 to vector<256x128xi32>
    %26 = arith.cmpi slt, %23, %25 : vector<256x128xi32>
    %c3_i32 = arith.constant 3 : i32
    %27 = vector.broadcast %c3_i32 : i32 to vector<256x128xi32>
    %28 = arith.cmpi slt, %24, %27 : vector<256x128xi32>
    %29 = arith.andi %26, %28 : vector<256x128xi1>
    %30 = arith.extui %29 : vector<256x128xi1> to vector<256x128xi32>
    %31 = arith.sitofp %30 : vector<256x128xi32> to vector<256x128xf32>
    %c0_15 = arith.constant 0 : index
    %c0_16 = arith.constant 0 : index
    %32 = vector.load %arg2[%c0_15, %c0_16] : memref<256x128xf32, #tpu.memory_space<vmem>>, vector<256x128xf32>
    %33 = arith.subf %18, %32 : vector<256x128xf32>
    %34 = arith.mulf %33, %31 : vector<256x128xf32>
    %35 = arith.mulf %34, %34 : vector<256x128xf32>
    %cst_17 = arith.constant dense<0.000000e+00> : vector<128xf32>
    %36 = vector.multi_reduction <add>, %35, %cst_17 [0] : vector<256x128xf32> to vector<128xf32>
    %37 = vector.shape_cast %36 : vector<128xf32> to vector<1x128xf32>
    %c0_18 = arith.constant 0 : index
    %c0_19 = arith.constant 0 : index
    %38 = vector.load %arg8[%c0_18, %c0_19] : memref<1x128xf32, #tpu.memory_space<vmem>>, vector<1x128xf32>
    tpu.vector_store %arg8[%c0_18, %c0_19], %37 {strides = array<i32>} : memref<1x128xf32, #tpu.memory_space<vmem>>, vector<1x128xf32>,
    return
  }
  func.func @transform_0(%arg0: i32) -> (i32, i32) {
    %c0_i32 = arith.constant 0 : i32
    %c0_i32_0 = arith.constant 0 : i32
    return %arg0, %c0_i32 : i32, i32
  }
  func.func @transform_1(%arg0: i32) -> (i32, i32) {
    %c0_i32 = arith.constant 0 : i32
    %c0_i32_0 = arith.constant 0 : i32
    return %arg0, %c0_i32 : i32, i32
  }
  func.func @transform_2(%arg0: i32) -> (i32, i32) {
    %c0_i32 = arith.constant 0 : i32
    %c0_i32_0 = arith.constant 0 : i32
    %c0_i32_1 = arith.constant 0 : i32
    return %c0_i32, %c0_i32_0 : i32, i32
  }
  func.func @transform_3(%arg0: i32) -> (i32, i32) {
    %c0_i32 = arith.constant 0 : i32
    %c0_i32_0 = arith.constant 0 : i32
    %c0_i32_1 = arith.constant 0 : i32
    return %c0_i32, %c0_i32_0 : i32, i32
  }
  func.func @transform_4(%arg0: i32) -> (i32, i32) {
    %c0_i32 = arith.constant 0 : i32
    %c0_i32_0 = arith.constant 0 : i32
    %c0_i32_1 = arith.constant 0 : i32
    return %c0_i32, %c0_i32_0 : i32, i32
  }
  func.func @transform_5(%arg0: i32) -> (i32, i32) {
    %c0_i32 = arith.constant 0 : i32
    %c0_i32_0 = arith.constant 0 : i32
    %c0_i32_1 = arith.constant 0 : i32
    return %c0_i32, %c0_i32_0 : i32, i32
  }
  func.func @transform_6(%arg0: i32) -> (i32, i32) {
    %c0_i32 = arith.constant 0 : i32
    %c0_i32_0 = arith.constant 0 : i32
    return %arg0, %c0_i32 : i32, i32
  }
  func.func @transform_7(%arg0: i32) -> (i32, i32) {
    %c0_i32 = arith.constant 0 : i32
    %c0_i32_0 = arith.constant 0 : i32
    return %arg0, %c0_i32 : i32, i32
  }
}

</mosaic_0001>

<bundles_post_ra>
// kernel: tpu_custom_call.1
= control target key start
LH: loop header
LB: loop body
LE: loop exit
PB: predicated region body
PF: predicated region fallthrough
CT: control target
= control target key end

     0   :  { %13 = vsyncpa [#allocation3], 0  ;;  %s2060_s0 = inlined_call_operand.vmem [shape: bf16[256,32], index: 0, kind: input, shape index: {}]   ;;  %s2061_s1 = inlined_call_operand.hbm [shape: f32[256,128], index: 1, kind: input, shape index: {}]   ;;  %s2062_s2 = inlined_call_operand.vmem [shape: bf16[32,64], index: 2, kind: input, shape index: {}]   ;;  %s2063_s3 = inlined_call_operand.vmem [shape: f32[1,64], index: 3, kind: input, shape index: {}]   ;;  %s2064_s4 = inlined_call_operand.vmem [shape: bf16[64,128], index: 4, kind: input, shape index: {}]   ;;  %s2065_s5 = inlined_call_operand.vmem [shape: f32[1,128], index: 5, kind: input, shape index: {}]   ;;  %s2066_s6 = inlined_call_operand.hbm [shape: f32[256,128], index: 6, kind: output, shape index: {0}]   ;;  %s2067_s7 = inlined_call_operand.hbm [shape: f32[1,128], index: 7, kind: output, shape index: {1}]  }
   0x1   :  { %14 = vsyncpa [#allocation4], 0 }
   0x2   :  { %15 = vsyncpa [#allocation7], 0  ;;  %s1765_s24 = smov [#allocation2]   ;;  %s1693_s28 = scalar_lea.hbm %s2061_s1, 4096 }
   0x3   :  { %s23_s25 = sshll.u32 %s1765_s24, 4  ;;  %p1694_p0 = scmp.ne.s32.totalorder %s2061_s1, %s1693_s28  ;;  %s24_s25 = int_to_ptr.vmem [resolvable:$true] %s23_s25 }
   0x4   :  { %p1697_p1 = scmp.lt.u32.totalorder %s1693_s28, %s2061_s1 }
   0x6   :  { %p1699_p2 = pnand %p1697_p1, %p1694_p0 }
   0x8   :  { %1702 = shalt.err (!%p1699_p2)
}
   0x9   :  { %s1703_s10 = scalar_lea.vmem %s24_s25, 4096  ;;  %p1708_p4 = scmp.lt.s32.totalorder %s24_s25, %s24_s25 }
   0xa   :  { %p1704_p3 = scmp.ne.s32.totalorder %s24_s25, %s1703_s10  ;;  %p1709_p5 = scmp.lt.s32.totalorder %s1703_s10, %s1703_s10 }
   0xc   :  { %p1710_p6 = por %p1709_p5, %p1708_p4 }
   0xe   :  { %p1711_p7 = pnand %p1710_p6, %p1704_p3 }
  0x10   :  { %1714 = shalt.err (!%p1711_p7)
}
  0x11   :  { %s1766_s11 = smov 128   ;;  %s1767_s12 = smov 8  }
  0x12   :  { %29 = dma.hbm_to_vmem [thread:$0]  %s2061_s1, 4096, %s24_s25, [#allocation3], %s1766_s11, %s1766_s11, %s1767_s12  }
  0x13   :  { %1759 = dma.done.wait [#allocation3], 4096  }
  0x14   :  { %1760 = vsyncadd [#allocation3], 4294963200  ;;  %v1543_v0 = vld [vmem:[%s2062_s2] sm:$0xff]   ;;  %v1544_v1 = vld [vmem:[%s2062_s2 + $0x8] sm:$0xff]   ;;  %vm177_vm0 = vcmask 261120   ;;  %vm474_vm1 = vcmask 523264  }
  0x15   :  { %1461 = vmatprep.subr.bf16.mxu0 %v1543_v0  ;;  %v1545_v2 = vld [vmem:[%s2060_s0] sm:$0xff]   ;;  %v1546_v3 = vld [vmem:[%s2060_s0 + $0x8] sm:$0xff]   ;;  %v1547_v4 = vld [vmem:[%s2060_s0 + $0x10] sm:$0xff]  }
  0x16   :  { %1462 = vmatpush3.bf16.msra.mxu0 %v1543_v0  ;;  %1465 = vmatprep.mubr.msk.bf16.mxu0 %vm177_vm0, %v1545_v2  ;;  %v1548_v5 = vld [vmem:[%s2060_s0 + $0x18] sm:$0xff]   ;;  %v1549_v6 = vld [vmem:[%s2060_s0 + $0x20] sm:$0xff]   ;;  %v1562_v8 = vld [vmem:[%s2064_s4 + $0x8] sm:$0xff]  }
  0x17   :  { %1463 = vmatprep.subr.bf16.mxu0 %v1544_v1  ;;  %v1561_v7 = vld [vmem:[%s2064_s4] sm:$0xff]   ;;  %v1550_v9 = vld [vmem:[%s2060_s0 + $0x28] sm:$0xff]   ;;  %v1551_v10 = vld [vmem:[%s2060_s0 + $0x30] sm:$0xff]  }
  0x18   :  { %1497 = vmatprep.subr.bf16.mxu1 %v1561_v7  ;;  %v1552_v11 = vld [vmem:[%s2060_s0 + $0x38] sm:$0xff]   ;;  %v1553_v12 = vld [vmem:[%s2060_s0 + $0x40] sm:$0xff]   ;;  %v1554_v13 = vld [vmem:[%s2060_s0 + $0x48] sm:$0xff]  }
  0x19   :  { %1498 = vmatpush3.bf16.msra.mxu1 %v1561_v7  ;;  %v1555_v14 = vld [vmem:[%s2060_s0 + $0x50] sm:$0xff]   ;;  %v1556_v15 = vld [vmem:[%s2060_s0 + $0x58] sm:$0xff]   ;;  %v1557_v16 = vld [vmem:[%s2060_s0 + $0x60] sm:$0xff]  }
  0x1a   :  { %1464 = vmatpush3.bf16.msra.mxu0 %v1544_v1  ;;  %1499 = vmatprep.subr.bf16.mxu1 %v1562_v8  ;;  %v1558_v17 = vld [vmem:[%s2060_s0 + $0x68] sm:$0xff]   ;;  %v1559_v18 = vld [vmem:[%s2060_s0 + $0x70] sm:$0xff]   ;;  %v1560_v19 = vld [vmem:[%s2060_s0 + $0x78] sm:$0xff]  }
  0x1b   :  { %v1563_v20 = vld [vmem:[%s2064_s4 + $0x10] sm:$0xff]   ;;  %v1564_v21 = vld [vmem:[%s2064_s4 + $0x18] sm:$0xff]   ;;  %v1911_v22 = vld [vmem:[%s2063_s3] ss:$0 sm:$0xff]  ;;  %s1769_s4 = smov [#allocation5]  }
  0x1d   :  { %1466 = vmatmul.mubr.msk.bf16.vlgmr.msra.gmra.mrb[0].mxu0 %vm177_vm0, %v1546_v3  ;;  %1500 = vmatpush3.bf16.msra.mxu1 %v1562_v8 }
  0x1e   :  { %1469 = vmatprep.mubr.msk.bf16.mxu0 %vm177_vm0, %v1547_v4  ;;  %1501 = vmatprep.subr.bf16.mxu1 %v1563_v20 }
  0x21   :  { %1502 = vmatpush3.bf16.msra.mxu1 %v1563_v20 }
  0x22   :  { %1503 = vmatprep.subr.bf16.mxu1 %v1564_v21 }
  0x25   :  { %1470 = vmatmul.mubr.msk.bf16.gmra.mrb[4].mxu0 %vm177_vm0, %v1548_v5  ;;  %1504 = vmatpush3.bf16.msra.mxu1 %v1564_v21 }
  0x26   :  { %1473 = vmatprep.mubr.msk.bf16.mxu0 %vm177_vm0, %v1549_v6 }
  0x2d   :  { %1474 = vmatmul.mubr.msk.bf16.gmra.mrb[8].mxu0 %vm177_vm0, %v1550_v9 }
  0x2e   :  { %1477 = vmatprep.mubr.msk.bf16.mxu0 %vm177_vm0, %v1551_v10 }
  0x35   :  { %1478 = vmatmul.mubr.msk.bf16.gmra.mrb[12].mxu0 %vm177_vm0, %v1552_v11 }
  0x36   :  { %1481 = vmatprep.mubr.msk.bf16.mxu0 %vm177_vm0, %v1553_v12 }
  0x3d   :  { %1482 = vmatmul.mubr.msk.bf16.gmra.mrb[16].mxu0 %vm177_vm0, %v1554_v13 }
  0x3e   :  { %1485 = vmatprep.mubr.msk.bf16.mxu0 %vm177_vm0, %v1555_v14 }
  0x45   :  { %1486 = vmatmul.mubr.msk.bf16.gmra.mrb[20].mxu0 %vm177_vm0, %v1556_v15 }
  0x46   :  { %1489 = vmatprep.mubr.msk.bf16.mxu0 %vm177_vm0, %v1557_v16 }
  0x4d   :  { %1490 = vmatmul.mubr.msk.bf16.gmra.mrb[24].mxu0 %vm177_vm0, %v1558_v17 }
  0x4e   :  { %1493 = vmatprep.mubr.msk.bf16.mxu0 %vm177_vm0, %v1559_v18 }
  0x55   :  { %1494 = vmatmul.mubr.msk.bf16.gmra.mrb[28].mxu0 %vm177_vm0, %v1560_v19 }
  0xf0   :  { %v1467_v23 = vpop.f32.mrb[0].mxu0 }
  0xf1   :  { %v269_v24 = vadd.f32 %v1467_v23, %v1911_v22  ;;  %v260_v25 = vpop.f32.mrb[1].mxu0 }
  0xf2   :  { %v261_v26 = vadd.f32 %v1911_v22, %v260_v25  ;;  %v1468_v27 = vpop.f32.mrb[2].mxu0 }
  0xf3   :  { %v272_v28 = vadd.f32 %v1468_v27, %v1911_v22  ;;  %v263_v29 = vpop.f32.mrb[3].mxu0  ;;  %v389_v31 = vmax.f32 %v269_v24, 0.0 }
  0xf4   :  { %v264_v30 = vadd.f32 %v1911_v22, %v263_v29  ;;  %v387_v33 = vmax.f32 %v261_v26, 0.0 }
  0xf5   :  { %v390_v32 = vmax.f32 %v272_v28, 0.0 }
  0xf6   :  { %v388_v34 = vmax.f32 %v264_v30, 0.0 }
  0xf7   :  { %v420_v35 = vpack.c.bf16 %v390_v32, %v389_v31 }
  0xf8   :  { %v1471_v36 = vpop.f32.mrb[4].mxu0  ;;  %v419_v37 = vpack.c.bf16 %v388_v34, %v387_v33 }
  0xf9   :  { %v285_v38 = vadd.f32 %v1471_v36, %v1911_v22  ;;  %v276_v39 = vpop.f32.mrb[5].mxu0 }
  0xfa   :  { %v277_v40 = vadd.f32 %v1911_v22, %v276_v39  ;;  %v1472_v41 = vpop.f32.mrb[6].mxu0  ;;  %1505 = vmatprep.mubr.msk.bf16.mxu1 %vm474_vm1, %v419_v37 }
  0xfb   :  { %v288_v42 = vadd.f32 %v1472_v41, %v1911_v22  ;;  %v279_v43 = vpop.f32.mrb[7].mxu0  ;;  %1506 = vmatmul.mubr.msk.bf16.vlgmr.msra.gmra.mrb[0].mxu1 %vm474_vm1, %v420_v35  ;;  %v393_v45 = vmax.f32 %v285_v38, 0.0 }
  0xfc   :  { %v280_v44 = vadd.f32 %v1911_v22, %v279_v43  ;;  %v391_v47 = vmax.f32 %v277_v40, 0.0 }
  0xfd   :  { %v394_v46 = vmax.f32 %v288_v42, 0.0 }
  0xfe   :  { %v392_v48 = vmax.f32 %v280_v44, 0.0 }
  0xff   :  { %v422_v49 = vpack.c.bf16 %v394_v46, %v393_v45 }
 0x100   :  { %v421_v50 = vpack.c.bf16 %v392_v48, %v391_v47  ;;  %v1475_v51 = vpop.f32.mrb[8].mxu0 }
 0x101   :  { %v301_v52 = vadd.f32 %v1475_v51, %v1911_v22  ;;  %v292_v53 = vpop.f32.mrb[9].mxu0 }
 0x102   :  { %v293_v54 = vadd.f32 %v1911_v22, %v292_v53  ;;  %v1476_v55 = vpop.f32.mrb[10].mxu0  ;;  %1509 = vmatprep.mubr.msk.bf16.mxu1 %vm474_vm1, %v421_v50 }
 0x103   :  { %v304_v56 = vadd.f32 %v1476_v55, %v1911_v22  ;;  %v295_v57 = vpop.f32.mrb[11].mxu0  ;;  %1510 = vmatmul.mubr.msk.bf16.gmra.mrb[4].mxu1 %vm474_vm1, %v422_v49  ;;  %v397_v59 = vmax.f32 %v301_v52, 0.0 }
 0x104   :  { %v296_v58 = vadd.f32 %v1911_v22, %v295_v57  ;;  %v395_v61 = vmax.f32 %v293_v54, 0.0 }
 0x105   :  { %v398_v60 = vmax.f32 %v304_v56, 0.0 }
 0x106   :  { %v396_v62 = vmax.f32 %v296_v58, 0.0 }
 0x107   :  { %v424_v63 = vpack.c.bf16 %v398_v60, %v397_v59 }
 0x108   :  { %v423_v0 = vpack.c.bf16 %v396_v62, %v395_v61  ;;  %v1479_v1 = vpop.f32.mrb[12].mxu0 }
 0x109   :  { %v317_v2 = vadd.f32 %v1479_v1, %v1911_v22  ;;  %v308_v3 = vpop.f32.mrb[13].mxu0 }
 0x10a   :  { %v309_v4 = vadd.f32 %v1911_v22, %v308_v3  ;;  %v1480_v5 = vpop.f32.mrb[14].mxu0  ;;  %1513 = vmatprep.mubr.msk.bf16.mxu1 %vm474_vm1, %v423_v0 }
 0x10b   :  { %v320_v6 = vadd.f32 %v1480_v5, %v1911_v22  ;;  %v311_v7 = vpop.f32.mrb[15].mxu0  ;;  %1514 = vmatmul.mubr.msk.bf16.gmra.mrb[8].mxu1 %vm474_vm1, %v424_v63  ;;  %v401_v9 = vmax.f32 %v317_v2, 0.0 }
 0x10c   :  { %v312_v8 = vadd.f32 %v1911_v22, %v311_v7  ;;  %v399_v11 = vmax.f32 %v309_v4, 0.0 }
 0x10d   :  { %v402_v10 = vmax.f32 %v320_v6, 0.0 }
 0x10e   :  { %v400_v12 = vmax.f32 %v312_v8, 0.0  ;;  %v1964_v8 = vld [vmem:[%s2065_s5] ss:$0 sm:$0xff]  ;;  %s1277_s5 = sshll.u32 %s1769_s4, 4  ;;  %s1278_s5 = int_to_ptr.vmem [resolvable:$true] %s1277_s5 }
 0x10f   :  { %v426_v13 = vpack.c.bf16 %v402_v10, %v401_v9  ;;  %s1715_s15 = scalar_lea.vmem %s1278_s5, 4096  ;;  %p1720_p9 = scmp.lt.s32.totalorder %s1278_s5, %s1278_s5 }
 0x110   :  { %v425_v14 = vpack.c.bf16 %v400_v12, %v399_v11  ;;  %v1483_v15 = vpop.f32.mrb[16].mxu0  ;;  %p1716_p8 = scmp.ne.s32.totalorder %s1278_s5, %s1715_s15  ;;  %p1721_p10 = scmp.lt.s32.totalorder %s1715_s15, %s1715_s15 }
 0x111   :  { %v333_v16 = vadd.f32 %v1483_v15, %v1911_v22  ;;  %v324_v17 = vpop.f32.mrb[17].mxu0 }
 0x112   :  { %v325_v18 = vadd.f32 %v1911_v22, %v324_v17  ;;  %v1484_v19 = vpop.f32.mrb[18].mxu0  ;;  %1517 = vmatprep.mubr.msk.bf16.mxu1 %vm474_vm1, %v425_v14  ;;  %p1722_p11 = por %p1721_p10, %p1720_p9 }
 0x113   :  { %v336_v20 = vadd.f32 %v1484_v19, %v1911_v22  ;;  %v327_v21 = vpop.f32.mrb[19].mxu0  ;;  %1518 = vmatmul.mubr.msk.bf16.gmra.mrb[12].mxu1 %vm474_vm1, %v426_v13  ;;  %v405_v24 = vmax.f32 %v333_v16, 0.0 }
 0x114   :  { %v328_v23 = vadd.f32 %v1911_v22, %v327_v21  ;;  %v403_v26 = vmax.f32 %v325_v18, 0.0  ;;  %p1723_p12 = pnand %p1722_p11, %p1716_p8 }
 0x115   :  { %v406_v25 = vmax.f32 %v336_v20, 0.0 }
 0x116   :  { %v404_v27 = vmax.f32 %v328_v23, 0.0 }
 0x117   :  { %v428_v28 = vpack.c.bf16 %v406_v25, %v405_v24 }
 0x118   :  { %v427_v29 = vpack.c.bf16 %v404_v27, %v403_v26  ;;  %v1487_v30 = vpop.f32.mrb[20].mxu0 }
 0x119   :  { %v349_v31 = vadd.f32 %v1487_v30, %v1911_v22  ;;  %v340_v32 = vpop.f32.mrb[21].mxu0 }
 0x11a   :  { %v341_v33 = vadd.f32 %v1911_v22, %v340_v32  ;;  %v1488_v34 = vpop.f32.mrb[22].mxu0  ;;  %1521 = vmatprep.mubr.msk.bf16.mxu1 %vm474_vm1, %v427_v29 }
 0x11b   :  { %v352_v35 = vadd.f32 %v1488_v34, %v1911_v22  ;;  %v343_v36 = vpop.f32.mrb[23].mxu0  ;;  %1522 = vmatmul.mubr.msk.bf16.gmra.mrb[16].mxu1 %vm474_vm1, %v428_v28  ;;  %v409_v38 = vmax.f32 %v349_v31, 0.0 }
 0x11c   :  { %v344_v37 = vadd.f32 %v1911_v22, %v343_v36  ;;  %v407_v40 = vmax.f32 %v341_v33, 0.0  ;;  %v975_v36 = vlaneseq }
 0x11d   :  { %v410_v39 = vmax.f32 %v352_v35, 0.0 }
 0x11e   :  { %v408_v41 = vmax.f32 %v344_v37, 0.0 }
 0x11f   :  { %v430_v42 = vpack.c.bf16 %v410_v39, %v409_v38 }
 0x120   :  { %v429_v43 = vpack.c.bf16 %v408_v41, %v407_v40  ;;  %v1491_v44 = vpop.f32.mrb[24].mxu0 }
 0x121   :  { %v365_v45 = vadd.f32 %v1491_v44, %v1911_v22  ;;  %v356_v46 = vpop.f32.mrb[25].mxu0 }
 0x122   :  { %v357_v47 = vadd.f32 %v1911_v22, %v356_v46  ;;  %v1492_v48 = vpop.f32.mrb[26].mxu0  ;;  %1525 = vmatprep.mubr.msk.bf16.mxu1 %vm474_vm1, %v429_v43 }
 0x123   :  { %v368_v49 = vadd.f32 %v1492_v48, %v1911_v22  ;;  %v359_v50 = vpop.f32.mrb[27].mxu0  ;;  %1526 = vmatmul.mubr.msk.bf16.gmra.mrb[20].mxu1 %vm474_vm1, %v430_v42  ;;  %v413_v52 = vmax.f32 %v365_v45, 0.0 }
 0x124   :  { %v360_v51 = vadd.f32 %v1911_v22, %v359_v50  ;;  %v411_v54 = vmax.f32 %v357_v47, 0.0  ;;  %v976_v50 = vand.u32 127, %v975_v36 }
 0x125   :  { %v414_v53 = vmax.f32 %v368_v49, 0.0 }
 0x126   :  { %v412_v55 = vmax.f32 %v360_v51, 0.0  ;;  %vm1009_vm2 = vcmp.lt.s32.totalorder %v976_v50, 3  ;;  %v1113_v50 = vld [vmem:[#allocation2 + $0x38] sm:$0xff] }
 0x127   :  { %v432_v56 = vpack.c.bf16 %v414_v53, %v413_v52 }
 0x128   :  { %v431_v57 = vpack.c.bf16 %v412_v55, %v411_v54  ;;  %v1495_v58 = vpop.f32.mrb[28].mxu0 }
 0x129   :  { %v381_v59 = vadd.f32 %v1495_v58, %v1911_v22  ;;  %v372_v60 = vpop.f32.mrb[29].mxu0 }
 0x12a   :  { %v373_v61 = vadd.f32 %v1911_v22, %v372_v60  ;;  %v1496_v62 = vpop.f32.mrb[30].mxu0  ;;  %1529 = vmatprep.mubr.msk.bf16.mxu1 %vm474_vm1, %v431_v57 }
 0x12b   :  { %v384_v63 = vadd.f32 %v1496_v62, %v1911_v22  ;;  %v375_v0 = vpop.f32.mrb[31].mxu0  ;;  %1530 = vmatmul.mubr.msk.bf16.gmra.mrb[24].mxu1 %vm474_vm1, %v432_v56  ;;  %v417_v2 = vmax.f32 %v381_v59, 0.0 }
 0x12c   :  { %v376_v1 = vadd.f32 %v1911_v22, %v375_v0  ;;  %v415_v4 = vmax.f32 %v373_v61, 0.0  ;;  %v1108_v0 = vld [vmem:[#allocation2 + $0x10] sm:$0xff] }
 0x12d   :  { %v418_v3 = vmax.f32 %v384_v63, 0.0 }
 0x12e   :  { %v416_v5 = vmax.f32 %v376_v1, 0.0 }
 0x12f   :  { %v434_v6 = vpack.c.bf16 %v418_v3, %v417_v2 }
 0x130   :  { %v433_v7 = vpack.c.bf16 %v416_v5, %v415_v4  ;;  %v1106_v4 = vld [vmem:[#allocation2] sm:$0xff] }
 0x132   :  { %1533 = vmatprep.mubr.msk.bf16.mxu1 %vm474_vm1, %v433_v7 }
 0x133   :  { %1534 = vmatmul.mubr.msk.bf16.gmra.mrb[28].mxu1 %vm474_vm1, %v434_v6 }
 0x1ce   :  { %v1507_v9 = vpop.f32.mrb[0].mxu1 }
 0x1cf   :  { %v566_v10 = vadd.f32 %v1507_v9, %v1964_v8  ;;  %v557_v11 = vpop.f32.mrb[1].mxu1 }
 0x1d0   :  { %v558_v22 = vadd.f32 %v1964_v8, %v557_v11  ;;  %v1508_v12 = vpop.f32.mrb[2].mxu1  ;;  %v1768_v11 = vmov 0.0  }
 0x1d1   :  { %v1361_v13 = vmul.f32 -1.442695, %v566_v10  ;;  %v569_v14 = vadd.f32 %v1508_v12, %v1964_v8  ;;  %v560_v15 = vpop.f32.mrb[3].mxu1  ;;  %v1109_v12 = vld [vmem:[#allocation2 + $0x18] sm:$0xff] }
 0x1d2   :  { %v1359_v16 = vmul.f32 -1.442695, %v558_v22  ;;  %v561_v17 = vadd.f32 %v1964_v8, %v560_v15  ;;  %v1982_v22 = vsel %vm1009_vm2, 1.0, %v1768_v11 }
 0x1d3   :  { %1565 = vpow2.f32 %v1361_v13  ;;  %v1362_v18 = vmul.f32 -1.442695, %v569_v14 }
 0x1d4   :  { %1567 = vpow2.f32 %v1359_v16  ;;  %v1360_v19 = vmul.f32 -1.442695, %v561_v17  ;;  %v1107_v17 = vld [vmem:[#allocation2 + $0x8] sm:$0xff] }
 0x1d5   :  { %1569 = vpow2.f32 %v1362_v18 }
 0x1d6   :  { %1571 = vpow2.f32 %v1360_v19  ;;  %v1511_v20 = vpop.f32.mrb[4].mxu1 }
 0x1d7   :  { %v582_v21 = vadd.f32 %v1511_v20, %v1964_v8  ;;  %v573_v23 = vpop.f32.mrb[5].mxu1 }
 0x1d8   :  { %v574_v24 = vadd.f32 %v1964_v8, %v573_v23  ;;  %v1512_v25 = vpop.f32.mrb[6].mxu1 }
 0x1d9   :  { %v1365_v26 = vmul.f32 -1.442695, %v582_v21  ;;  %v585_v27 = vadd.f32 %v1512_v25, %v1964_v8  ;;  %v576_v28 = vpop.f32.mrb[7].mxu1 }
 0x1da   :  { %v1363_v29 = vmul.f32 -1.442695, %v574_v24  ;;  %v577_v30 = vadd.f32 %v1964_v8, %v576_v28 }
 0x1db   :  { %1573 = vpow2.f32 %v1365_v26  ;;  %v1366_v31 = vmul.f32 -1.442695, %v585_v27 }
 0x1dc   :  { %1575 = vpow2.f32 %v1363_v29  ;;  %v1364_v32 = vmul.f32 -1.442695, %v577_v30 }
 0x1dd   :  { %v1566_v33 = vpop.eup %1565  ;;  %1577 = vpow2.f32 %v1366_v31 }
 0x1de   :  { %v1568_v34 = vpop.eup %1567  ;;  %v782_v35 = vadd.f32 1.0, %v1566_v33  ;;  %1579 = vpow2.f32 %v1364_v32  ;;  %v1515_v37 = vpop.f32.mrb[8].mxu1 }
 0x1df   :  { %v1570_v38 = vpop.eup %1569  ;;  %v780_v39 = vadd.f32 1.0, %v1568_v34  ;;  %v598_v40 = vadd.f32 %v1515_v37, %v1964_v8  ;;  %v589_v41 = vpop.f32.mrb[9].mxu1 }
 0x1e0   :  { %v1572_v42 = vpop.eup %1571  ;;  %1581 = vrcp.f32 %v782_v35  ;;  %v783_v43 = vadd.f32 1.0, %v1570_v38  ;;  %v590_v44 = vadd.f32 %v1964_v8, %v589_v41  ;;  %v1516_v45 = vpop.f32.mrb[10].mxu1  ;;  %v1112_v38 = vld [vmem:[#allocation2 + $0x30] sm:$0xff] }
 0x1e1   :  { %1583 = vrcp.f32 %v780_v39  ;;  %v781_v46 = vadd.f32 1.0, %v1572_v42  ;;  %v1369_v47 = vmul.f32 -1.442695, %v598_v40  ;;  %v601_v48 = vadd.f32 %v1516_v45, %v1964_v8  ;;  %v592_v49 = vpop.f32.mrb[11].mxu1 }
 0x1e2   :  { %1585 = vrcp.f32 %v783_v43  ;;  %v1367_v51 = vmul.f32 -1.442695, %v590_v44  ;;  %v593_v52 = vadd.f32 %v1964_v8, %v592_v49  ;;  %v1110_v44 = vld [vmem:[#allocation2 + $0x20] sm:$0xff] }
 0x1e3   :  { %1587 = vrcp.f32 %v781_v46  ;;  %v1370_v53 = vmul.f32 -1.442695, %v601_v48 }
 0x1e4   :  { %1589 = vpow2.f32 %v1369_v47  ;;  %v1368_v54 = vmul.f32 -1.442695, %v593_v52 }
 0x1e5   :  { %v1574_v55 = vpop.eup %1573  ;;  %1591 = vpow2.f32 %v1367_v51 }
 0x1e6   :  { %v1576_v56 = vpop.eup %1575  ;;  %v786_v57 = vadd.f32 1.0, %v1574_v55  ;;  %1593 = vpow2.f32 %v1370_v53  ;;  %v1519_v58 = vpop.f32.mrb[12].mxu1  ;;  %v1111_v55 = vld [vmem:[#allocation2 + $0x28] sm:$0xff] }
 0x1e7   :  { %v1578_v59 = vpop.eup %1577  ;;  %v784_v60 = vadd.f32 1.0, %v1576_v56  ;;  %1595 = vpow2.f32 %v1368_v54  ;;  %v614_v61 = vadd.f32 %v1519_v58, %v1964_v8  ;;  %v605_v62 = vpop.f32.mrb[13].mxu1 }
 0x1e8   :  { %v1580_v63 = vpop.eup %1579  ;;  %1597 = vrcp.f32 %v786_v57  ;;  %v787_v1 = vadd.f32 1.0, %v1578_v59  ;;  %v606_v2 = vadd.f32 %v1964_v8, %v605_v62  ;;  %v1520_v3 = vpop.f32.mrb[14].mxu1 }
 0x1e9   :  { %1599 = vrcp.f32 %v784_v60  ;;  %v785_v5 = vadd.f32 1.0, %v1580_v63  ;;  %v1373_v6 = vmul.f32 -1.442695, %v614_v61  ;;  %v617_v7 = vadd.f32 %v1520_v3, %v1964_v8  ;;  %v608_v9 = vpop.f32.mrb[15].mxu1 }
 0x1ea   :  { %v1582_v10 = vpop.eup %1581  ;;  %1601 = vrcp.f32 %v787_v1  ;;  %v1371_v13 = vmul.f32 -1.442695, %v606_v2  ;;  %v609_v14 = vadd.f32 %v1964_v8, %v608_v9 }
 0x1eb   :  { %v1584_v15 = vpop.eup %1583  ;;  %878 = vst [vmem:[#allocation5 + $0x10] sm:$0xff] %v1582_v10  ;;  %v1140_v16 = vsub.f32 %v1582_v10, %v1108_v0  ;;  %1603 = vrcp.f32 %v785_v5  ;;  %v1374_v18 = vmul.f32 -1.442695, %v617_v7 }
 0x1ec   :  { %v1586_v19 = vpop.eup %1585  ;;  %876 = vst [vmem:[#allocation5] sm:$0xff] %v1584_v15  ;;  %v1138_v20 = vsub.f32 %v1584_v15, %v1106_v4  ;;  %1605 = vpow2.f32 %v1373_v6  ;;  %v1372_v21 = vmul.f32 -1.442695, %v609_v14 }
 0x1ed   :  { %v1588_v23 = vpop.eup %1587  ;;  %v1172_v24 = vmul.f32 %v1982_v22, %v1140_v16  ;;  %879 = vst [vmem:[#allocation5 + $0x18] sm:$0xff] %v1586_v19  ;;  %v1141_v25 = vsub.f32 %v1586_v19, %v1109_v12  ;;  %1607 = vpow2.f32 %v1371_v13 }
 0x1ee   :  { %v1590_v26 = vpop.eup %1589  ;;  %v1170_v27 = vmul.f32 %v1982_v22, %v1138_v20  ;;  %877 = vst [vmem:[#allocation5 + $0x8] sm:$0xff] %v1588_v23  ;;  %v1139_v28 = vsub.f32 %v1588_v23, %v1107_v17  ;;  %1609 = vpow2.f32 %v1374_v18  ;;  %v1523_v29 = vpop.f32.mrb[16].mxu1  ;;  %v1116_v20 = vld [vmem:[#allocation2 + $0x50] sm:$0xff] }
 0x1ef   :  { %v1592_v30 = vpop.eup %1591  ;;  %v1204_v31 = vmul.f32 %v1172_v24, %v1172_v24  ;;  %v1173_v32 = vmul.f32 %v1982_v22, %v1141_v25  ;;  %v790_v33 = vadd.f32 1.0, %v1590_v26  ;;  %1611 = vpow2.f32 %v1372_v21  ;;  %v621_v34 = vpop.f32.mrb[17].mxu1 }
 0x1f0   :  { %v1594_v35 = vpop.eup %1593  ;;  %v1202_v36 = vmul.f32 %v1170_v27, %v1170_v27  ;;  %v1171_v37 = vmul.f32 %v1982_v22, %v1139_v28  ;;  %v788_v39 = vadd.f32 1.0, %v1592_v30  ;;  %v630_v40 = vadd.f32 %v1523_v29, %v1964_v8  ;;  %v1524_v41 = vpop.f32.mrb[18].mxu1  ;;  %v1114_v27 = vld [vmem:[#allocation2 + $0x40] sm:$0xff]  ;;  %v1117_v30 = vld [vmem:[#allocation2 + $0x58] sm:$0xff] }
 0x1f1   :  { %v1596_v42 = vpop.eup %1595  ;;  %v1205_v43 = vmul.f32 %v1173_v32, %v1173_v32  ;;  %1613 = vrcp.f32 %v790_v33  ;;  %v791_v45 = vadd.f32 1.0, %v1594_v35  ;;  %v622_v46 = vadd.f32 %v1964_v8, %v621_v34  ;;  %v624_v47 = vpop.f32.mrb[19].mxu1 }
 0x1f2   :  { %v1598_v48 = vpop.eup %1597  ;;  %v1203_v49 = vmul.f32 %v1171_v37, %v1171_v37  ;;  %1615 = vrcp.f32 %v788_v39  ;;  %v789_v51 = vadd.f32 1.0, %v1596_v42  ;;  %v1377_v52 = vmul.f32 -1.442695, %v630_v40  ;;  %v1115_v37 = vld [vmem:[#allocation2 + $0x48] sm:$0xff] }
 0x1f3   :  { %v1600_v53 = vpop.eup %1599  ;;  %882 = vst [vmem:[#allocation5 + $0x30] sm:$0xff] %v1598_v48  ;;  %v1144_v54 = vsub.f32 %v1598_v48, %v1112_v38  ;;  %1617 = vrcp.f32 %v791_v45  ;;  %v1375_v56 = vmul.f32 -1.442695, %v622_v46  ;;  %v633_v57 = vadd.f32 %v1524_v41, %v1964_v8 }
 0x1f4   :  { %v1602_v58 = vpop.eup %1601  ;;  %v1234_v59 = vadd.f32 %v1203_v49, %v1202_v36  ;;  %880 = vst [vmem:[#allocation5 + $0x20] sm:$0xff] %v1600_v53  ;;  %v1142_v60 = vsub.f32 %v1600_v53, %v1110_v44  ;;  %1619 = vrcp.f32 %v789_v51  ;;  %v625_v61 = vadd.f32 %v1964_v8, %v624_v47 }
 0x1f5   :  { %v1604_v62 = vpop.eup %1603  ;;  %v1176_v63 = vmul.f32 %v1982_v22, %v1144_v54  ;;  %883 = vst [vmem:[#allocation5 + $0x38] sm:$0xff] %v1602_v58  ;;  %v1145_v0 = vsub.f32 %v1602_v58, %v1113_v50  ;;  %1621 = vpow2.f32 %v1377_v52  ;;  %v1378_v1 = vmul.f32 -1.442695, %v633_v57 }
 0x1f6   :  { %v1606_v2 = vpop.eup %1605  ;;  %v1235_v3 = vadd.f32 %v1234_v59, %v1204_v31  ;;  %v1174_v4 = vmul.f32 %v1982_v22, %v1142_v60  ;;  %881 = vst [vmem:[#allocation5 + $0x28] sm:$0xff] %v1604_v62  ;;  %v1143_v5 = vsub.f32 %v1604_v62, %v1111_v55  ;;  %1623 = vpow2.f32 %v1375_v56  ;;  %v1527_v6 = vpop.f32.mrb[20].mxu1 }
 0x1f7   :  { %v1608_v7 = vpop.eup %1607  ;;  %v1208_v9 = vmul.f32 %v1176_v63, %v1176_v63  ;;  %v794_v10 = vadd.f32 1.0, %v1606_v2  ;;  %1625 = vpow2.f32 %v1378_v1  ;;  %v637_v11 = vpop.f32.mrb[21].mxu1  ;;  %v1177_v19 = vmul.f32 %v1982_v22, %v1145_v0  ;;  %v1120_v63 = vld [vmem:[#allocation2 + $0x70] sm:$0xff] }
 0x1f8   :  { %v1610_v12 = vpop.eup %1609  ;;  %v1206_v13 = vmul.f32 %v1174_v4, %v1174_v4  ;;  %v1236_v14 = vadd.f32 %v1235_v3, %v1205_v43  ;;  %v1175_v15 = vmul.f32 %v1982_v22, %v1143_v5  ;;  %v792_v16 = vadd.f32 1.0, %v1608_v7  ;;  %v1528_v17 = vpop.f32.mrb[22].mxu1  ;;  %v1118_v3 = vld [vmem:[#allocation2 + $0x60] sm:$0xff] }
 0x1f9   :  { %v1612_v18 = vpop.eup %1611  ;;  %1627 = vrcp.f32 %v794_v10  ;;  %v795_v21 = vadd.f32 1.0, %v1610_v12  ;;  %v1376_v23 = vmul.f32 -1.442695, %v625_v61  ;;  %v640_v24 = vpop.f32.mrb[23].mxu1  ;;  %v646_v31 = vadd.f32 %v1527_v6, %v1964_v8  ;;  %v1121_v10 = vld [vmem:[#allocation2 + $0x78] sm:$0xff] }
 0x1fa   :  { %v1237_v25 = vadd.f32 %v1236_v14, %v1206_v13  ;;  %v1207_v26 = vmul.f32 %v1175_v15, %v1175_v15  ;;  %1629 = vrcp.f32 %v792_v16  ;;  %v793_v28 = vadd.f32 1.0, %v1612_v18  ;;  %v1119_v14 = vld [vmem:[#allocation2 + $0x68] sm:$0xff] }
 0x1fb   :  { %v1614_v29 = vpop.eup %1613  ;;  %1631 = vrcp.f32 %v795_v21  ;;  %v638_v32 = vadd.f32 %v1964_v8, %v637_v11  ;;  %v649_v33 = vadd.f32 %v1528_v17, %v1964_v8  ;;  %v641_v38 = vadd.f32 %v1964_v8, %v640_v24 }
 0x1fc   :  { %v1616_v34 = vpop.eup %1615  ;;  %v1238_v35 = vadd.f32 %v1237_v25, %v1207_v26  ;;  %886 = vst [vmem:[#allocation5 + $0x50] sm:$0xff] %v1614_v29  ;;  %v1148_v36 = vsub.f32 %v1614_v29, %v1116_v20  ;;  %1633 = vrcp.f32 %v793_v28  ;;  %v1381_v41 = vmul.f32 -1.442695, %v646_v31 }
 0x1fd   :  { %v1618_v39 = vpop.eup %1617  ;;  %884 = vst [vmem:[#allocation5 + $0x40] sm:$0xff] %v1616_v34  ;;  %v1146_v40 = vsub.f32 %v1616_v34, %v1114_v27  ;;  %1635 = vpow2.f32 %v1376_v23  ;;  %v1379_v42 = vmul.f32 -1.442695, %v638_v32  ;;  %v1209_v44 = vmul.f32 %v1177_v19, %v1177_v19 }
 0x1fe   :  { %v1620_v43 = vpop.eup %1619  ;;  %v1239_v45 = vadd.f32 %v1238_v35, %v1208_v9  ;;  %v1180_v46 = vmul.f32 %v1982_v22, %v1148_v36  ;;  %887 = vst [vmem:[#allocation5 + $0x58] sm:$0xff] %v1618_v39  ;;  %v1149_v47 = vsub.f32 %v1618_v39, %v1117_v30  ;;  %v1531_v48 = vpop.f32.mrb[24].mxu1  ;;  %1637 = vpow2.f32 %v1381_v41 }
 0x1ff   :  { %v1622_v49 = vpop.eup %1621  ;;  %v1178_v50 = vmul.f32 %v1982_v22, %v1146_v40  ;;  %885 = vst [vmem:[#allocation5 + $0x48] sm:$0xff] %v1620_v43  ;;  %v1147_v51 = vsub.f32 %v1620_v43, %v1115_v37  ;;  %v1382_v52 = vmul.f32 -1.442695, %v649_v33  ;;  %v653_v53 = vpop.f32.mrb[25].mxu1  ;;  %v1380_v58 = vmul.f32 -1.442695, %v641_v38 }
 0x200   :  { %v1624_v54 = vpop.eup %1623  ;;  %v1212_v55 = vmul.f32 %v1180_v46, %v1180_v46  ;;  %v1240_v56 = vadd.f32 %v1239_v45, %v1209_v44  ;;  %v798_v57 = vadd.f32 1.0, %v1622_v49  ;;  %v1532_v59 = vpop.f32.mrb[26].mxu1  ;;  %1639 = vpow2.f32 %v1379_v42  ;;  %v1122_v46 = vld [vmem:[#allocation2 + $0x80] sm:$0xff] }
 0x201   :  { %v1626_v60 = vpop.eup %1625  ;;  %v1210_v61 = vmul.f32 %v1178_v50, %v1178_v50  ;;  %v1179_v62 = vmul.f32 %v1982_v22, %v1147_v51  ;;  %v796_v0 = vadd.f32 1.0, %v1624_v54  ;;  %v656_v1 = vpop.f32.mrb[27].mxu1  ;;  %v1181_v2 = vmul.f32 %v1982_v22, %v1149_v47 }
 0x202   :  { %1641 = vrcp.f32 %v798_v57  ;;  %v799_v4 = vadd.f32 1.0, %v1626_v60  ;;  %v662_v5 = vadd.f32 %v1531_v48, %v1964_v8  ;;  %v654_v11 = vadd.f32 %v1964_v8, %v653_v53 }
 0x203   :  { %v1628_v6 = vpop.eup %1627  ;;  %v1241_v7 = vadd.f32 %v1240_v56, %v1210_v61  ;;  %v1211_v9 = vmul.f32 %v1179_v62, %v1179_v62  ;;  %1643 = vrcp.f32 %v796_v0  ;;  %v665_v16 = vadd.f32 %v1532_v59, %v1964_v8  ;;  %v1124_v0 = vld [vmem:[#allocation2 + $0x90] sm:$0xff] }
 0x204   :  { %v1630_v12 = vpop.eup %1629  ;;  %890 = vst [vmem:[#allocation5 + $0x70] sm:$0xff] %v1628_v6  ;;  %v1152_v13 = vsub.f32 %v1628_v6, %v1120_v63  ;;  %1645 = vrcp.f32 %v799_v4  ;;  %v1385_v15 = vmul.f32 -1.442695, %v662_v5  ;;  %v1383_v20 = vmul.f32 -1.442695, %v654_v11 }
 0x205   :  { %v1632_v17 = vpop.eup %1631  ;;  %v1242_v18 = vadd.f32 %v1241_v7, %v1211_v9  ;;  %888 = vst [vmem:[#allocation5 + $0x60] sm:$0xff] %v1630_v12  ;;  %v1150_v19 = vsub.f32 %v1630_v12, %v1118_v3  ;;  %1647 = vpow2.f32 %v1382_v52  ;;  %v1213_v23 = vmul.f32 %v1181_v2, %v1181_v2  ;;  %v1125_v9 = vld [vmem:[#allocation2 + $0x98] sm:$0xff] }
 0x206   :  { %v1634_v21 = vpop.eup %1633  ;;  %891 = vst [vmem:[#allocation5 + $0x78] sm:$0xff] %v1632_v17  ;;  %v1153_v24 = vsub.f32 %v1632_v17, %v1121_v10  ;;  %1649 = vpow2.f32 %v1380_v58  ;;  %v1386_v25 = vmul.f32 -1.442695, %v665_v16  ;;  %v1535_v26 = vpop.f32.mrb[28].mxu1  ;;  %v1184_v32 = vmul.f32 %v1982_v22, %v1152_v13  ;;  %v1123_v10 = vld [vmem:[#allocation2 + $0x88] sm:$0xff] }
 0x207   :  { %v1636_v27 = vpop.eup %1635  ;;  %v1243_v28 = vadd.f32 %v1242_v18, %v1212_v55  ;;  %v1182_v29 = vmul.f32 %v1982_v22, %v1150_v19  ;;  %889 = vst [vmem:[#allocation5 + $0x68] sm:$0xff] %v1634_v21  ;;  %v1151_v30 = vsub.f32 %v1634_v21, %v1119_v14  ;;  %1651 = vpow2.f32 %v1385_v15  ;;  %v669_v31 = vpop.f32.mrb[29].mxu1 }
 0x208   :  { %v797_v33 = vadd.f32 1.0, %v1636_v27  ;;  %1653 = vpow2.f32 %v1383_v20  ;;  %v1536_v34 = vpop.f32.mrb[30].mxu1  ;;  %v1638_v35 = vpop.eup %1637  ;;  %v1185_v40 = vmul.f32 %v1982_v22, %v1153_v24  ;;  %v657_v42 = vadd.f32 %v1964_v8, %v656_v1  ;;  %v1126_v24 = vld [vmem:[#allocation2 + $0xa0] sm:$0xff] }
 0x209   :  { %v1214_v36 = vmul.f32 %v1182_v29, %v1182_v29  ;;  %v1244_v37 = vadd.f32 %v1243_v28, %v1213_v23  ;;  %v1183_v38 = vmul.f32 %v1982_v22, %v1151_v30  ;;  %1655 = vpow2.f32 %v1386_v25  ;;  %v672_v39 = vpop.f32.mrb[31].mxu1 }
 0x20a   :  { %1657 = vrcp.f32 %v797_v33  ;;  %v802_v41 = vadd.f32 1.0, %v1638_v35  ;;  %v1640_v43 = vpop.eup %1639  ;;  %v678_v47 = vadd.f32 %v1535_v26, %v1964_v8  ;;  %v670_v48 = vadd.f32 %v1964_v8, %v669_v31  ;;  %v1128_v31 = vld [vmem:[#allocation2 + $0xb0] sm:$0xff] }
 0x20b   :  { %v1245_v44 = vadd.f32 %v1244_v37, %v1214_v36  ;;  %v1215_v45 = vmul.f32 %v1183_v38, %v1183_v38  ;;  %v800_v50 = vadd.f32 1.0, %v1640_v43  ;;  %v1384_v51 = vmul.f32 -1.442695, %v657_v42  ;;  %v1129_v38 = vld [vmem:[#allocation2 + $0xb8] sm:$0xff] }
 0x20c   :  { %v1642_v49 = vpop.eup %1641  ;;  %1659 = vrcp.f32 %v802_v41  ;;  %v681_v52 = vadd.f32 %v1536_v34, %v1964_v8  ;;  %v1216_v54 = vmul.f32 %v1184_v32, %v1184_v32  ;;  %v1389_v56 = vmul.f32 -1.442695, %v678_v47  ;;  %v1130_v47 = vld [vmem:[#allocation2 + $0xc0] sm:$0xff] }
 0x20d   :  { %v1644_v53 = vpop.eup %1643  ;;  %v1246_v55 = vadd.f32 %v1245_v44, %v1215_v45  ;;  %894 = vst [vmem:[#allocation5 + $0x90] sm:$0xff] %v1642_v49  ;;  %1661 = vrcp.f32 %v800_v50  ;;  %v673_v59 = vadd.f32 %v1964_v8, %v672_v39  ;;  %v1217_v61 = vmul.f32 %v1185_v40, %v1185_v40  ;;  %v1127_v39 = vld [vmem:[#allocation2 + $0xa8] sm:$0xff] }
 0x20e   :  { %v1646_v57 = vpop.eup %1645  ;;  %892 = vst [vmem:[#allocation5 + $0x80] sm:$0xff] %v1644_v53  ;;  %v1154_v58 = vsub.f32 %v1644_v53, %v1122_v46  ;;  %1663 = vpow2.f32 %v1384_v51  ;;  %v1156_v12 = vsub.f32 %v1642_v49, %v1124_v0  ;;  %v1387_v14 = vmul.f32 -1.442695, %v670_v48 }
 0x20f   :  { %v1648_v60 = vpop.eup %1647  ;;  %v1247_v62 = vadd.f32 %v1246_v55, %v1216_v54  ;;  %895 = vst [vmem:[#allocation5 + $0x98] sm:$0xff] %v1646_v57  ;;  %1665 = vpow2.f32 %v1389_v56  ;;  %v1390_v18 = vmul.f32 -1.442695, %v681_v52  ;;  %v1157_v19 = vsub.f32 %v1646_v57, %v1125_v9 }
 0x210   :  { %v1650_v63 = vpop.eup %1649  ;;  %v1186_v1 = vmul.f32 %v1982_v22, %v1154_v58  ;;  %v803_v2 = vadd.f32 1.0, %v1648_v60  ;;  %v1388_v21 = vmul.f32 -1.442695, %v673_v59  ;;  %v1188_v25 = vmul.f32 %v1982_v22, %v1156_v12 }
 0x211   :  { %v1652_v3 = vpop.eup %1651  ;;  %v1248_v4 = vadd.f32 %v1247_v62, %v1217_v61  ;;  %v801_v5 = vadd.f32 1.0, %v1650_v63  ;;  %v1189_v29 = vmul.f32 %v1982_v22, %v1157_v19  ;;  %v1132_v62 = vld [vmem:[#allocation2 + $0xd0] sm:$0xff] }
 0x212   :  { %v1654_v6 = vpop.eup %1653  ;;  %v1218_v7 = vmul.f32 %v1186_v1, %v1186_v1  ;;  %1667 = vrcp.f32 %v803_v2  ;;  %v806_v8 = vadd.f32 1.0, %v1652_v3  ;;  %v1220_v35 = vmul.f32 %v1188_v25, %v1188_v25 }
 0x213   :  { %v1656_v11 = vpop.eup %1655  ;;  %1669 = vrcp.f32 %v801_v5  ;;  %v804_v13 = vadd.f32 1.0, %v1654_v6  ;;  %v1221_v44 = vmul.f32 %v1189_v29, %v1189_v29  ;;  %v1133_v5 = vld [vmem:[#allocation2 + $0xd8] sm:$0xff]  ;;  %v1131_v6 = vld [vmem:[#allocation2 + $0xc8] sm:$0xff] }
 0x214   :  { %v1658_v15 = vpop.eup %1657  ;;  %v1249_v16 = vadd.f32 %v1248_v4, %v1218_v7  ;;  %1671 = vrcp.f32 %v806_v8  ;;  %v807_v17 = vadd.f32 1.0, %v1656_v11  ;;  %v1137_v29 = vld [vmem:[#allocation2 + $0xf8] sm:$0xff] }
 0x215   :  { %893 = vst [vmem:[#allocation5 + $0x88] sm:$0xff] %v1658_v15  ;;  %v1155_v20 = vsub.f32 %v1658_v15, %v1123_v10  ;;  %1673 = vrcp.f32 %v804_v13 }
 0x216   :  { %v1660_v23 = vpop.eup %1659  ;;  %1675 = vrcp.f32 %v807_v17 }
 0x217   :  { %v1187_v26 = vmul.f32 %v1982_v22, %v1155_v20  ;;  %898 = vst [vmem:[#allocation5 + $0xb0] sm:$0xff] %v1660_v23  ;;  %1677 = vpow2.f32 %v1387_v14  ;;  %v1662_v27 = vpop.eup %1661  ;;  %v1160_v42 = vsub.f32 %v1660_v23, %v1128_v31  ;;  %v1136_v23 = vld [vmem:[#allocation2 + $0xf0] sm:$0xff] }
 0x218   :  { %1679 = vpow2.f32 %v1390_v18  ;;  %v1664_v28 = vpop.eup %1663  ;;  %896 = vst [vmem:[#allocation5 + $0xa0] sm:$0xff] %v1662_v27  ;;  %v1158_v32 = vsub.f32 %v1662_v27, %v1126_v24  ;;  %v1134_v24 = vld [vmem:[#allocation2 + $0xe0] sm:$0xff] }
 0x219   :  { %v1219_v30 = vmul.f32 %v1187_v26, %v1187_v26  ;;  %1681 = vpow2.f32 %v1388_v21  ;;  %v1666_v33 = vpop.eup %1665  ;;  %v805_v34 = vadd.f32 1.0, %v1664_v28  ;;  %v1192_v54 = vmul.f32 %v1982_v22, %v1160_v42  ;;  %v1135_v28 = vld [vmem:[#allocation2 + $0xe8] sm:$0xff] }
 0x21a   :  { %v1190_v37 = vmul.f32 %v1982_v22, %v1158_v32  ;;  %v810_v40 = vadd.f32 1.0, %v1666_v33 }
 0x21b   :  { %v1250_v36 = vadd.f32 %v1249_v16, %v1219_v30  ;;  %1683 = vrcp.f32 %v805_v34  ;;  %v1224_v3 = vmul.f32 %v1192_v54, %v1192_v54 }
 0x21c   :  { %v1668_v41 = vpop.eup %1667  ;;  %v1222_v46 = vmul.f32 %v1190_v37, %v1190_v37  ;;  %1685 = vrcp.f32 %v810_v40 }
 0x21d   :  { %v1670_v43 = vpop.eup %1669  ;;  %v1251_v45 = vadd.f32 %v1250_v36, %v1220_v35  ;;  %899 = vst [vmem:[#allocation5 + $0xb8] sm:$0xff] %v1668_v41  ;;  %v1161_v49 = vsub.f32 %v1668_v41, %v1129_v38 }
 0x21e   :  { %v1672_v48 = vpop.eup %1671  ;;  %897 = vst [vmem:[#allocation5 + $0xa8] sm:$0xff] %v1670_v43  ;;  %v1159_v50 = vsub.f32 %v1670_v43, %v1127_v39 }
 0x21f   :  { %v1674_v51 = vpop.eup %1673  ;;  %v1252_v52 = vadd.f32 %v1251_v45, %v1221_v44  ;;  %902 = vst [vmem:[#allocation5 + $0xd0] sm:$0xff] %v1672_v48  ;;  %v1193_v60 = vmul.f32 %v1982_v22, %v1161_v49  ;;  %v1164_v9 = vsub.f32 %v1672_v48, %v1132_v62 }
 0x220   :  { %v1676_v53 = vpop.eup %1675  ;;  %v1191_v55 = vmul.f32 %v1982_v22, %v1159_v50  ;;  %900 = vst [vmem:[#allocation5 + $0xc0] sm:$0xff] %v1674_v51  ;;  %v1162_v56 = vsub.f32 %v1674_v51, %v1130_v47 }
 0x221   :  { %v1678_v57 = vpop.eup %1677  ;;  %v1253_v58 = vadd.f32 %v1252_v52, %v1222_v46  ;;  %903 = vst [vmem:[#allocation5 + $0xd8] sm:$0xff] %v1676_v53  ;;  %v1225_v8 = vmul.f32 %v1193_v60, %v1193_v60  ;;  %v1165_v14 = vsub.f32 %v1676_v53, %v1133_v5  ;;  %v1196_v17 = vmul.f32 %v1982_v22, %v1164_v9 }
 0x222   :  { %v1680_v59 = vpop.eup %1679  ;;  %v1223_v61 = vmul.f32 %v1191_v55, %v1191_v55  ;;  %v1194_v63 = vmul.f32 %v1982_v22, %v1162_v56  ;;  %v808_v0 = vadd.f32 1.0, %v1678_v57 }
 0x223   :  { %v1682_v1 = vpop.eup %1681  ;;  %v811_v2 = vadd.f32 1.0, %v1680_v59  ;;  %v1197_v20 = vmul.f32 %v1982_v22, %v1165_v14  ;;  %v1228_v25 = vmul.f32 %v1196_v17, %v1196_v17 }
 0x224   :  { %v1254_v4 = vadd.f32 %v1253_v58, %v1223_v61  ;;  %1687 = vrcp.f32 %v808_v0  ;;  %v809_v7 = vadd.f32 1.0, %v1682_v1  ;;  %v1226_v12 = vmul.f32 %v1194_v63, %v1194_v63 }
 0x225   :  { %1689 = vrcp.f32 %v811_v2  ;;  %v1684_v10 = vpop.eup %1683  ;;  %v1229_v31 = vmul.f32 %v1197_v20, %v1197_v20 }
 0x226   :  { %v1255_v11 = vadd.f32 %v1254_v4, %v1224_v3  ;;  %1691 = vrcp.f32 %v809_v7  ;;  %v1686_v13 = vpop.eup %1685  ;;  %901 = vst [vmem:[#allocation5 + $0xc8] sm:$0xff] %v1684_v10  ;;  %v1163_v15 = vsub.f32 %v1684_v10, %v1131_v6 }
 0x227   :  { %906 = vst [vmem:[#allocation5 + $0xf0] sm:$0xff] %v1686_v13  ;;  %v1168_v32 = vsub.f32 %v1686_v13, %v1136_v23 }
 0x228   :  { %v1256_v16 = vadd.f32 %v1255_v11, %v1225_v8  ;;  %v1195_v18 = vmul.f32 %v1982_v22, %v1163_v15 }
 0x22a   :  { %v1257_v19 = vadd.f32 %v1256_v16, %v1226_v12  ;;  %v1227_v21 = vmul.f32 %v1195_v18, %v1195_v18 }
 0x22c   :  { %v1258_v26 = vadd.f32 %v1257_v19, %v1227_v21 }
 0x22e   :  { %v1688_v27 = vpop.eup %1687  ;;  %v1259_v34 = vadd.f32 %v1258_v26, %v1228_v25 }
 0x22f   :  { %v1690_v30 = vpop.eup %1689  ;;  %904 = vst [vmem:[#allocation5 + $0xe0] sm:$0xff] %v1688_v27  ;;  %v1166_v33 = vsub.f32 %v1688_v27, %v1134_v24 }
 0x230   :  { %v1692_v35 = vpop.eup %1691  ;;  %907 = vst [vmem:[#allocation5 + $0xf8] sm:$0xff] %v1690_v30  ;;  %v1169_v38 = vsub.f32 %v1690_v30, %v1137_v29  ;;  %v1260_v39 = vadd.f32 %v1259_v34, %v1229_v31 }
 0x231   :  { %v1198_v36 = vmul.f32 %v1982_v22, %v1166_v33  ;;  %905 = vst [vmem:[#allocation5 + $0xe8] sm:$0xff] %v1692_v35  ;;  %v1167_v37 = vsub.f32 %v1692_v35, %v1135_v28 }
 0x232   :  { %1726 = shalt.err (!%p1723_p12)
}
 0x233   :  { %s1727_s18 = scalar_lea.hbm %s2066_s6, 4096 }
 0x234   :  { %p1728_p13 = scmp.ne.s32.totalorder %s2066_s6, %s1727_s18  ;;  %p1731_p0 = scmp.lt.u32.totalorder %s1727_s18, %s2066_s6 }
 0x236   :  { %p1733_p1 = pnand %p1731_p0, %p1728_p13 }
 0x238   :  { %1736 = shalt.err (!%p1733_p1)
}
 0x239   :  { %1283 = dma.vmem_to_hbm [thread:$0]  %s1278_s5, 4096, %s2066_s6, [#allocation4], %s1766_s11, %s1766_s11, %s1767_s12   ;;  %v1199_v40 = vmul.f32 %v1982_v22, %v1167_v37  ;;  %v1200_v41 = vmul.f32 %v1982_v22, %v1168_v32  ;;  %v1230_v42 = vmul.f32 %v1198_v36, %v1198_v36  ;;  %v1201_v43 = vmul.f32 %v1982_v22, %v1169_v38 }
 0x23a   :  { %s1770_s2 = smov [#allocation6]  }
 0x23b   :  { %v1231_v44 = vmul.f32 %v1199_v40, %v1199_v40  ;;  %v1261_v45 = vadd.f32 %v1260_v39, %v1230_v42  ;;  %v1232_v46 = vmul.f32 %v1200_v41, %v1200_v41  ;;  %v1233_v48 = vmul.f32 %v1201_v43, %v1201_v43  ;;  %s1290_s6 = sshll.u32 %s1770_s2, 4  ;;  %s1291_s6 = int_to_ptr.vmem [resolvable:$true] %s1290_s6 }
 0x23c   :  { %s1737_s11 = scalar_lea.vmem %s1291_s6, 16  ;;  %s1741_s12 = scalar_lea.vmem %s1291_s6, 32 }
 0x23d   :  { %v1262_v47 = vadd.f32 %v1261_v45, %v1231_v44  ;;  %p1738_p2 = scmp.ne.s32.totalorder %s1291_s6, %s1737_s11  ;;  %p1742_p3 = scmp.lt.s32.totalorder %s1291_s6, %s1291_s6 }
 0x23e   :  { %p1743_p4 = scmp.lt.s32.totalorder %s1741_s12, %s1737_s11 }
 0x23f   :  { %v1263_v49 = vadd.f32 %v1262_v47, %v1232_v46 }
 0x240   :  { %p1744_p5 = por %p1743_p4, %p1742_p3 }
 0x241   :  { %v1264_v50 = vadd.f32 %v1263_v49, %v1233_v48 }
 0x242   :  { %p1745_p6 = pnand %p1744_p5, %p1738_p2 }
 0x243   :  { %v1265_v51 = vrot.slane %v1264_v50, 4 }
 0x245   :  { %v1266_v52 = vadd.f32 %v1265_v51, %v1264_v50 }
 0x247   :  { %v1267_v53 = vrot.slane %v1266_v52, 2 }
 0x249   :  { %v1268_v54 = vadd.f32 %v1267_v53, %v1266_v52 }
 0x24b   :  { %v1269_v55 = vrot.slane %v1268_v54, 1 }
 0x24d   :  { %v1270_v56 = vadd.f32 %v1269_v55, %v1268_v54 }
 0x24f   :  { %1271 = vst [vmem:[#allocation6] sm:$0x1] %v1270_v56 }
 0x250   :  { %1748 = shalt.err (!%p1745_p6)
}
 0x251   :  { %s1749_s26 = scalar_lea.hbm %s2067_s7, 16 }
 0x252   :  { %p1750_p7 = scmp.ne.s32.totalorder %s2067_s7, %s1749_s26  ;;  %p1753_p8 = scmp.lt.u32.totalorder %s1749_s26, %s2067_s7 }
 0x254   :  { %p1755_p9 = pnand %p1753_p8, %p1750_p7 }
 0x256   :  { %1758 = shalt.err (!%p1755_p9)
}
 0x257   :  { %1293 = dma.vmem_to_hbm [thread:$0]  %s1291_s6, 16, %s2067_s7, [#allocation7]  }
 0x258   :  { %1761 = dma.done.wait [#allocation4], 4096  }
 0x259   :  { %1762 = vsyncadd [#allocation4], 4294963200 }
 0x25a   :  { %1763 = dma.done.wait [#allocation7], 16  }
 0x25b   :  { %1764 = vsyncadd [#allocation7], 4294967280 }
 0x25c   :  { %1300 = vsyncpa [#allocation3], 1 }
 0x25d   :  { %1301 = vsyncpa [#allocation4], 1 }
 0x25e   :  { %1302 = vsyncpa [#allocation7], 1 }

</bundles_post_ra>
